<compile_context>
chip_gen: v7x
topology: tpu7x:2x2x1
jax: 0.10.0
libtpu: 0.0.40
codegen_flags: <defaults>
</compile_context>

<pallas_src>
import functools

import jax
import jax.numpy as jnp
from jax.experimental import pallas as pl
from jax.experimental.pallas import tpu as pltpu


def resnet_block_kernel(
    x_ref,      # (C_in_p, N*L)      input slab, compute dtype (bf16 or f32)
    w1_ref,     # (K, C_out, C_in_p) conv1 weight, one (C_out, C) matrix per tap
    g1_ref,     # (C_out, 1) f32     bn1 gamma
    be1_ref,    # (C_out, 1) f32     bn1 beta
    w2_ref,     # (K, C_out, C_out)  conv2 weight per tap (no bias)
    g2_ref,     # (C_out, 1) f32     bn2 gamma
    be2_ref,    # (C_out, 1) f32     bn2 beta
    wup_ref,    # (C_out, C_in_p)    1x1 skip conv weight
    bup_ref,    # (C_out, 1) f32     1x1 skip conv bias
    out_ref,    # (C_out, N*L)       output (f32 by default)
    *, k, length, n_batch, eps,
):
    nl = n_batch * length
    pad = (k - 1) // 2
    cdt = x_ref.dtype

    # Position within each folded sequence, built in-kernel (no HBM DMA).
    lane = jax.lax.broadcasted_iota(jnp.int32, (1, nl), 1) % length

    # Hoisted per-tap validity masks, shared by conv1 and conv2.  They zero
    # both the 'same'-padding region and any cross-batch leakage at the N*L
    # folding boundaries, so no padded scratch buffer is ever needed.
    # (For lane in [0, L): s>0 only needs lane < L-s; s<0 only needs lane >= -s.)
    masks = {}
    for t in range(k):
        s = t - pad
        if s > 0:
            masks[t] = lane < (length - s)
        elif s < 0:
            masks[t] = lane >= (-s)

    def conv(a, w_ref):
        """a: (C, N*L) cdt; w_ref: (K, C_out, C).  Returns (C_out, N*L) f32.

        Tap t reads a[:, l + t - pad] via an XLU lane rotation + hoisted mask
        and is folded in with an accumulating matmul, so no (K*C, N*L) im2col
        slab is ever materialized.
        """
        acc = None
        for t in range(k):
            s = t - pad
            if s == 0:
                tap = a
            else:
                # roll(a, -s): column l now holds a[:, l + s]; wrap is masked off.
                sh = pltpu.roll(a, shift=(-s) % nl, axis=1)
                tap = jnp.where(masks[t], sh, jnp.zeros((), cdt))
            p = jnp.dot(w_ref[t], tap, preferred_element_type=jnp.float32)
            acc = p if acc is None else acc + p
        return acc

    inv_nl = 1.0 / float(nl)

    def bn_scale_bias(z, g, b):
        """Training-mode BN over the folded (N, L) axis, returned as per-channel
        FMA coefficients; single-pass f32 statistics (sum + sum-of-squares)."""
        mean = jnp.sum(z, axis=1, keepdims=True) * inv_nl
        ex2 = jnp.sum(z * z, axis=1, keepdims=True) * inv_nl
        var = jnp.maximum(ex2 - mean * mean, 0.0)
        scale = g * jax.lax.rsqrt(var + eps)
        return scale, b - mean * scale

    x = x_ref[...]

    # conv1 (bias omitted: exactly cancelled by BN1 mean subtraction) -> BN1 -> ReLU
    z1 = conv(x, w1_ref)
    sc1, bi1 = bn_scale_bias(z1, g1_ref[...], be1_ref[...])
    h1 = jnp.maximum(z1 * sc1 + bi1, 0.0)

    # conv2 (no bias) -> BN2
    z2 = conv(h1.astype(cdt), w2_ref)
    sc2, bi2 = bn_scale_bias(z2, g2_ref[...], be2_ref[...])
    y2 = z2 * sc2 + bi2

    # 1x1 skip conv + residual add + final ReLU (lane-dense store, width N*L)
    up = jnp.dot(wup_ref[...], x, preferred_element_type=jnp.float32) + bup_ref[...]
    out_ref[...] = jnp.maximum(y2 + up, 0.0).astype(out_ref.dtype)


def resnet_block(x, params, *, kernel_size, eps=1e-5,
                 compute_dtype=jnp.bfloat16, out_dtype=jnp.float32):
    """x: (N, C_in, L) float32. params: dict of weights. Returns (N, C_out, L)."""
    if kernel_size % 2 == 0:
        kernel_size += 1                  # mirrors the PyTorch module's __init__
    n, c_in, length = x.shape
    k = kernel_size
    w1, g1, be1 = params["w1"], params["g1"], params["be1"]
    w2, g2, be2 = params["w2"], params["g2"], params["be2"]
    wup, bup = params["wup"], params["bup"]
    c_out = w1.shape[0]
    nl = n * length

    # pad C_in up to a sublane multiple (8) so conv1/skip operands tile cleanly
    c_in_p = ((c_in + 7) // 8) * 8
    cp = c_in_p - c_in

    # activations: (N, C_in, L) -> lane-dense (C_in_p, N*L) slab.
    # TODO(synk): at production sizes carry activations in (C, N, L) layout (or
    # feed per-batch (C, L) blocks via the tiled grid below) so this transpose
    # — an extra HBM read+write of the full activation — disappears.
    x_slab = jnp.transpose(jnp.pad(x, ((0, 0), (0, cp), (0, 0))), (1, 0, 2))
    x_slab = x_slab.reshape(c_in_p, nl).astype(compute_dtype)

    # per-tap weights, tap-leading: w[t] is the (C_out, C) matrix for tap t
    w1_t = jnp.transpose(jnp.pad(w1, ((0, 0), (0, cp), (0, 0))),
                         (2, 0, 1)).astype(compute_dtype)
    w2_t = jnp.transpose(w2, (2, 0, 1)).astype(compute_dtype)
    wup_p = jnp.pad(wup, ((0, 0), (0, cp))).astype(compute_dtype)

    col = lambda v: v.reshape(-1, 1).astype(jnp.float32)

    kern = functools.partial(resnet_block_kernel, k=k, length=length,
                             n_batch=n, eps=eps)
    vmem = pl.BlockSpec(memory_space=pltpu.MemorySpace.VMEM)

    # TODO(synk): for production-size N*L, add a batch-group-tiled grid (tile
    # width G*L with G*L % 128 == 0; the cross-batch masks already remove any
    # need for K-1 halo DMAs), split BN into a stats pass + apply pass so the
    # statistics stay global (per-tile stats would change numerics), keep the
    # weight BlockSpecs on a constant index_map so they stay VMEM-resident,
    # size tiles per generation with pltpu.CompilerParams(vmem_limit_bytes=...)
    # (~2x smaller on v7x's 64 MiB), mark the tile axis "parallel" so v7x's two
    # TensorCores are used, and try pipeline_mode=pl.Buffered(3) on the
    # activation spec where VMEM headroom exists (v5e/v6e).  The toy problem
    # here is fully VMEM-resident, so it runs grid-less.
    out_slab = pl.pallas_call(
        kern,
        out_shape=jax.ShapeDtypeStruct((c_out, nl), out_dtype),
        in_specs=[vmem] * 9,
        out_specs=vmem,
    )(x_slab, w1_t, col(g1), col(be1), w2_t, col(g2), col(be2), wup_p, col(bup))

    # (C_out, N*L) -> (N, C_out, L)
    return jnp.transpose(out_slab.reshape(c_out, n, length), (1, 0, 2))


def resnet_block_reference(x, params, *, kernel_size, eps=1e-5):
    """Pure-JAX reference of the PyTorch forward (training-mode BN)."""
    if kernel_size % 2 == 0:
        kernel_size += 1

    def conv1d_same(inp, w, b):
        out = jax.lax.conv_general_dilated(
            inp, w, window_strides=(1,), padding="SAME",
            dimension_numbers=("NCH", "OIH", "NCH"),
        )
        if b is not None:
            out = out + b[None, :, None]
        return out

    def bn(inp, g, b):
        m = inp.mean(axis=(0, 2), keepdims=True)
        v = ((inp - m) ** 2).mean(axis=(0, 2), keepdims=True)
        return g[None, :, None] * (inp - m) / jnp.sqrt(v + eps) + b[None, :, None]

    z = conv1d_same(x, params["w1"], params["b1"])
    z = jax.nn.relu(bn(z, params["g1"], params["be1"]))
    z = conv1d_same(z, params["w2"], None)
    z = bn(z, params["g2"], params["be2"])
    up = conv1d_same(x, params["wup"][..., None], params["bup"])
    return jax.nn.relu(z + up)


if __name__ == "__main__":
    # small shapes consistent with the module: Conv1d over (N, C, L)
    N, C_IN, C_OUT, L, K = 2, 4, 8, 64, 7

    key = jax.random.PRNGKey(0)
    k0, k1, k2, k3, k4, k5, k6, k7 = jax.random.split(key, 8)
    params = {
        "w1":  0.1 * jax.random.normal(k0, (C_OUT, C_IN, K), jnp.float32),
        "b1":  0.1 * jax.random.normal(k1, (C_OUT,), jnp.float32),  # cancelled by BN1
        "g1":  1.0 + 0.1 * jax.random.normal(k6, (C_OUT,), jnp.float32),
        "be1": 0.1 * jax.random.normal(k7, (C_OUT,), jnp.float32),
        "w2":  0.1 * jax.random.normal(k2, (C_OUT, C_OUT, K), jnp.float32),
        "g2":  jnp.ones((C_OUT,), jnp.float32),
        "be2": jnp.zeros((C_OUT,), jnp.float32),
        "wup": 0.1 * jax.random.normal(k3, (C_OUT, C_IN), jnp.float32),
        "bup": 0.1 * jax.random.normal(k4, (C_OUT,), jnp.float32),
    }
    x = jax.random.normal(k5, (N, C_IN, L), jnp.float32)

    ref = resnet_block_reference(x, params, kernel_size=K)

    # f32 operand path: tight check against the PyTorch-semantics reference
    out_f32 = jax.block_until_ready(
        resnet_block(x, params, kernel_size=K, compute_dtype=jnp.float32))
    err_f32 = float(jnp.max(jnp.abs(out_f32 - ref)))
    assert err_f32 < 2e-3, f"f32 mismatch vs reference: max abs err = {err_f32}"

    # bf16 MXU path (default): looser tolerance for bf16 operand rounding
    out_bf16 = jax.block_until_ready(resnet_block(x, params, kernel_size=K))
    err_bf16 = float(jnp.max(jnp.abs(out_bf16 - ref)))
    assert err_bf16 < 1e-1, f"bf16 mismatch vs reference: max abs err = {err_bf16}"

    print("KERNEL_OK")
</pallas_src>

<mosaic_0001>
module attributes {stable_mosaic.version = 11 : i64} {
  func.func @resnet_block_kernel(%arg0: memref<8x128xf32, #tpu.memory_space<vmem>>, %arg1: memref<7x8x8xf32, #tpu.memory_space<vmem>>, %arg2: memref<8x1xf32, #tpu.memory_space<vmem>>, %arg3: memref<8x1xf32, #tpu.memory_space<vmem>>, %arg4: memref<7x8x8xf32, #tpu.memory_space<vmem>>, %arg5: memref<8x1xf32, #tpu.memory_space<vmem>>, %arg6: memref<8x1xf32, #tpu.memory_space<vmem>>, %arg7: memref<8x8xf32, #tpu.memory_space<vmem>>, %arg8: memref<8x1xf32, #tpu.memory_space<vmem>>, %arg9: memref<8x128xf32, #tpu.memory_space<vmem>>) attributes {dimension_semantics = [], scalar_prefetch = 0 : i64, scratch_operands = 0 : i64, tpu.core_type = #tpu.core_type<tc>} {
    %0 = tpu.iota {dimensions = array<i32: 1>} : vector<1x128xi32>
    %c64_i32 = arith.constant 64 : i32
    %c0_i32 = arith.constant 0 : i32
    %1 = arith.cmpi eq, %c64_i32, %c0_i32 : i32
    %c1_i32 = arith.constant 1 : i32
    %2 = arith.select %1, %c1_i32, %c64_i32 : i32
    %3 = vector.broadcast %2 : i32 to vector<1x128xi32>
    %4 = arith.remsi %0, %3 : vector<1x128xi32>
    %c0_i32_0 = arith.constant 0 : i32
    %5 = vector.broadcast %c0_i32_0 : i32 to vector<1x128xi32>
    %6 = arith.cmpi ne, %4, %5 : vector<1x128xi32>
    %c0_i32_1 = arith.constant 0 : i32
    %7 = vector.broadcast %c0_i32_1 : i32 to vector<1x128xi32>
    %8 = arith.cmpi slt, %4, %7 : vector<1x128xi32>
    %c0_i32_2 = arith.constant 0 : i32
    %9 = arith.cmpi slt, %2, %c0_i32_2 : i32
    %10 = vector.broadcast %9 : i1 to vector<1x128xi1>
    %11 = vector.broadcast %10 : vector<1x128xi1> to vector<1x128xi1>
    %12 = arith.xori %8, %11 : vector<1x128xi1>
    %13 = arith.andi %12, %6 : vector<1x128xi1>
    %14 = vector.broadcast %2 : i32 to vector<1x128xi32>
    %15 = arith.addi %4, %14 : vector<1x128xi32>
    %16 = arith.select %13, %15, %4 : vector<1x128xi1>, vector<1x128xi32>
    %c3_i32 = arith.constant 3 : i32
    %17 = vector.broadcast %c3_i32 : i32 to vector<1x128xi32>
    %18 = arith.cmpi sge, %16, %17 : vector<1x128xi32>
    %c2_i32 = arith.constant 2 : i32
    %19 = vector.broadcast %c2_i32 : i32 to vector<1x128xi32>
    %20 = arith.cmpi sge, %16, %19 : vector<1x128xi32>
    %c1_i32_3 = arith.constant 1 : i32
    %21 = vector.broadcast %c1_i32_3 : i32 to vector<1x128xi32>
    %22 = arith.cmpi sge, %16, %21 : vector<1x128xi32>
    %c63_i32 = arith.constant 63 : i32
    %23 = vector.broadcast %c63_i32 : i32 to vector<1x128xi32>
    %24 = arith.cmpi slt, %16, %23 : vector<1x128xi32>
    %c62_i32 = arith.constant 62 : i32
    %25 = vector.broadcast %c62_i32 : i32 to vector<1x128xi32>
    %26 = arith.cmpi slt, %16, %25 : vector<1x128xi32>
    %c61_i32 = arith.constant 61 : i32
    %27 = vector.broadcast %c61_i32 : i32 to vector<1x128xi32>
    %28 = arith.cmpi slt, %16, %27 : vector<1x128xi32>
    %c0 = arith.constant 0 : index
    %c0_4 = arith.constant 0 : index
    %29 = vector.load %arg0[%c0, %c0_4] : memref<8x128xf32, #tpu.memory_space<vmem>>, vector<8x128xf32>
    %c3_i32_5 = arith.constant 3 : i32
    %30 = tpu.dynamic_rotate %29 by %c3_i32_5 dim 1 : vector<8x128xf32>, i32 -> vector<8x128xf32>
    %cst = arith.constant 0.000000e+00 : f32
    %31 = vector.shape_cast %18 : vector<1x128xi1> to vector<1x128xi1>
    %32 = vector.broadcast %31 : vector<1x128xi1> to vector<8x128xi1>
    %33 = vector.broadcast %cst : f32 to vector<8x128xf32>
    %34 = arith.select %32, %30, %33 : vector<8x128xi1>, vector<8x128xf32>
    %c0_6 = arith.constant 0 : index
    %c0_7 = arith.constant 0 : index
    %c0_8 = arith.constant 0 : index
    %35 = vector.load %arg1[%c0_6, %c0_7, %c0_8] : memref<7x8x8xf32, #tpu.memory_space<vmem>>, vector<1x8x8xf32>
    %36 = vector.shape_cast %35 : vector<1x8x8xf32> to vector<8x8xf32>
    %cst_9 = arith.constant dense<0.000000e+00> : vector<8x128xf32>
    %37 = tpu.matmul %36, %34, %cst_9 {dimension_numbers = #tpu.dot_dimension_numbers<[1], [0], [0], [1], [0, 0, 1, 1], [], []>} : vector<8x8xf32>, vector<8x128xf32>, vector<8x128xf32> -> vector<8x128xf32>
    %c2_i32_10 = arith.constant 2 : i32
    %38 = tpu.dynamic_rotate %29 by %c2_i32_10 dim 1 : vector<8x128xf32>, i32 -> vector<8x128xf32>
    %cst_11 = arith.constant 0.000000e+00 : f32
    %39 = vector.shape_cast %20 : vector<1x128xi1> to vector<1x128xi1>
    %40 = vector.broadcast %39 : vector<1x128xi1> to vector<8x128xi1>
    %41 = vector.broadcast %cst_11 : f32 to vector<8x128xf32>
    %42 = arith.select %40, %38, %41 : vector<8x128xi1>, vector<8x128xf32>
    %c1 = arith.constant 1 : index
    %c0_12 = arith.constant 0 : index
    %c0_13 = arith.constant 0 : index
    %43 = vector.load %arg1[%c1, %c0_12, %c0_13] : memref<7x8x8xf32, #tpu.memory_space<vmem>>, vector<1x8x8xf32>
    %44 = vector.shape_cast %43 : vector<1x8x8xf32> to vector<8x8xf32>
    %cst_14 = arith.constant dense<0.000000e+00> : vector<8x128xf32>
    %45 = tpu.matmul %44, %42, %cst_14 {dimension_numbers = #tpu.dot_dimension_numbers<[1], [0], [0], [1], [0, 0, 1, 1], [], []>} : vector<8x8xf32>, vector<8x128xf32>, vector<8x128xf32> -> vector<8x128xf32>
    %46 = arith.addf %37, %45 : vector<8x128xf32>
    %c1_i32_15 = arith.constant 1 : i32
    %47 = tpu.dynamic_rotate %29 by %c1_i32_15 dim 1 : vector<8x128xf32>, i32 -> vector<8x128xf32>
    %cst_16 = arith.constant 0.000000e+00 : f32
    %48 = vector.shape_cast %22 : vector<1x128xi1> to vector<1x128xi1>
    %49 = vector.broadcast %48 : vector<1x128xi1> to vector<8x128xi1>
    %50 = vector.broadcast %cst_16 : f32 to vector<8x128xf32>
    %51 = arith.select %49, %47, %50 : vector<8x128xi1>, vector<8x128xf32>
    %c2 = arith.constant 2 : index
    %c0_17 = arith.constant 0 : index
    %c0_18 = arith.constant 0 : index
    %52 = vector.load %arg1[%c2, %c0_17, %c0_18] : memref<7x8x8xf32, #tpu.memory_space<vmem>>, vector<1x8x8xf32>
    %53 = vector.shape_cast %52 : vector<1x8x8xf32> to vector<8x8xf32>
    %cst_19 = arith.constant dense<0.000000e+00> : vector<8x128xf32>
    %54 = tpu.matmul %53, %51, %cst_19 {dimension_numbers = #tpu.dot_dimension_numbers<[1], [0], [0], [1], [0, 0, 1, 1], [], []>} : vector<8x8xf32>, vector<8x128xf32>, vector<8x128xf32> -> vector<8x128xf32>
    %55 = arith.addf %46, %54 : vector<8x128xf32>
    %c3 = arith.constant 3 : index
    %c0_20 = arith.constant 0 : index
    %c0_21 = arith.constant 0 : index
    %56 = vector.load %arg1[%c3, %c0_20, %c0_21] : memref<7x8x8xf32, #tpu.memory_space<vmem>>, vector<1x8x8xf32>
    %57 = vector.shape_cast %56 : vector<1x8x8xf32> to vector<8x8xf32>
    %cst_22 = arith.constant dense<0.000000e+00> : vector<8x128xf32>
    %58 = tpu.matmul %57, %29, %cst_22 {dimension_numbers = #tpu.dot_dimension_numbers<[1], [0], [0], [1], [0, 0, 1, 1], [], []>} : vector<8x8xf32>, vector<8x128xf32>, vector<8x128xf32> -> vector<8x128xf32>
    %59 = arith.addf %55, %58 : vector<8x128xf32>
    %c127_i32 = arith.constant 127 : i32
    %60 = tpu.dynamic_rotate %29 by %c127_i32 dim 1 : vector<8x128xf32>, i32 -> vector<8x128xf32>
    %cst_23 = arith.constant 0.000000e+00 : f32
    %61 = vector.shape_cast %24 : vector<1x128xi1> to vector<1x128xi1>
    %62 = vector.broadcast %61 : vector<1x128xi1> to vector<8x128xi1>
    %63 = vector.broadcast %cst_23 : f32 to vector<8x128xf32>
    %64 = arith.select %62, %60, %63 : vector<8x128xi1>, vector<8x128xf32>
    %c4 = arith.constant 4 : index
    %c0_24 = arith.constant 0 : index
    %c0_25 = arith.constant 0 : index
    %65 = vector.load %arg1[%c4, %c0_24, %c0_25] : memref<7x8x8xf32, #tpu.memory_space<vmem>>, vector<1x8x8xf32>
    %66 = vector.shape_cast %65 : vector<1x8x8xf32> to vector<8x8xf32>
    %cst_26 = arith.constant dense<0.000000e+00> : vector<8x128xf32>
    %67 = tpu.matmul %66, %64, %cst_26 {dimension_numbers = #tpu.dot_dimension_numbers<[1], [0], [0], [1], [0, 0, 1, 1], [], []>} : vector<8x8xf32>, vector<8x128xf32>, vector<8x128xf32> -> vector<8x128xf32>
    %68 = arith.addf %59, %67 : vector<8x128xf32>
    %c126_i32 = arith.constant 126 : i32
    %69 = tpu.dynamic_rotate %29 by %c126_i32 dim 1 : vector<8x128xf32>, i32 -> vector<8x128xf32>
    %cst_27 = arith.constant 0.000000e+00 : f32
    %70 = vector.shape_cast %26 : vector<1x128xi1> to vector<1x128xi1>
    %71 = vector.broadcast %70 : vector<1x128xi1> to vector<8x128xi1>
    %72 = vector.broadcast %cst_27 : f32 to vector<8x128xf32>
    %73 = arith.select %71, %69, %72 : vector<8x128xi1>, vector<8x128xf32>
    %c5 = arith.constant 5 : index
    %c0_28 = arith.constant 0 : index
    %c0_29 = arith.constant 0 : index
    %74 = vector.load %arg1[%c5, %c0_28, %c0_29] : memref<7x8x8xf32, #tpu.memory_space<vmem>>, vector<1x8x8xf32>
    %75 = vector.shape_cast %74 : vector<1x8x8xf32> to vector<8x8xf32>
    %cst_30 = arith.constant dense<0.000000e+00> : vector<8x128xf32>
    %76 = tpu.matmul %75, %73, %cst_30 {dimension_numbers = #tpu.dot_dimension_numbers<[1], [0], [0], [1], [0, 0, 1, 1], [], []>} : vector<8x8xf32>, vector<8x128xf32>, vector<8x128xf32> -> vector<8x128xf32>
    %77 = arith.addf %68, %76 : vector<8x128xf32>
    %c125_i32 = arith.constant 125 : i32
    %78 = tpu.dynamic_rotate %29 by %c125_i32 dim 1 : vector<8x128xf32>, i32 -> vector<8x128xf32>
    %cst_31 = arith.constant 0.000000e+00 : f32
    %79 = vector.shape_cast %28 : vector<1x128xi1> to vector<1x128xi1>
    %80 = vector.broadcast %79 : vector<1x128xi1> to vector<8x128xi1>
    %81 = vector.broadcast %cst_31 : f32 to vector<8x128xf32>
    %82 = arith.select %80, %78, %81 : vector<8x128xi1>, vector<8x128xf32>
    %c6 = arith.constant 6 : index
    %c0_32 = arith.constant 0 : index
    %c0_33 = arith.constant 0 : index
    %83 = vector.load %arg1[%c6, %c0_32, %c0_33] : memref<7x8x8xf32, #tpu.memory_space<vmem>>, vector<1x8x8xf32>
    %84 = vector.shape_cast %83 : vector<1x8x8xf32> to vector<8x8xf32>
    %cst_34 = arith.constant dense<0.000000e+00> : vector<8x128xf32>
    %85 = tpu.matmul %84, %82, %cst_34 {dimension_numbers = #tpu.dot_dimension_numbers<[1], [0], [0], [1], [0, 0, 1, 1], [], []>} : vector<8x8xf32>, vector<8x128xf32>, vector<8x128xf32> -> vector<8x128xf32>
    %86 = arith.addf %77, %85 : vector<8x128xf32>
    %c0_35 = arith.constant 0 : index
    %c0_36 = arith.constant 0 : index
    %87 = vector.load %arg2[%c0_35, %c0_36] : memref<8x1xf32, #tpu.memory_space<vmem>>, vector<8x1xf32>
    %c0_37 = arith.constant 0 : index
    %c0_38 = arith.constant 0 : index
    %88 = vector.load %arg3[%c0_37, %c0_38] : memref<8x1xf32, #tpu.memory_space<vmem>>, vector<8x1xf32>
    %cst_39 = arith.constant dense<0.000000e+00> : vector<8xf32>
    %89 = vector.multi_reduction <add>, %86, %cst_39 [1] : vector<8x128xf32> to vector<8xf32>
    %90 = vector.shape_cast %89 : vector<8xf32> to vector<8x1xf32>
    %cst_40 = arith.constant 7.812500e-03 : f32
    %91 = vector.broadcast %cst_40 : f32 to vector<8x1xf32>
    %92 = arith.mulf %90, %91 : vector<8x1xf32>
    %93 = arith.mulf %86, %86 : vector<8x128xf32>
    %cst_41 = arith.constant dense<0.000000e+00> : vector<8xf32>
    %94 = vector.multi_reduction <add>, %93, %cst_41 [1] : vector<8x128xf32> to vector<8xf32>
    %95 = vector.shape_cast %94 : vector<8xf32> to vector<8x1xf32>
    %cst_42 = arith.constant 7.812500e-03 : f32
    %96 = vector.broadcast %cst_42 : f32 to vector<8x1xf32>
    %97 = arith.mulf %95, %96 : vector<8x1xf32>
    %98 = arith.mulf %92, %92 : vector<8x1xf32>
    %99 = arith.subf %97, %98 : vector<8x1xf32>
    %cst_43 = arith.constant 0.000000e+00 : f32
    %100 = vector.broadcast %cst_43 : f32 to vector<8x1xf32>
    %101 = arith.maximumf %99, %100 : vector<8x1xf32>
    %cst_44 = arith.constant 9.99999974E-6 : f32
    %102 = vector.broadcast %cst_44 : f32 to vector<8x1xf32>
    %103 = arith.addf %101, %102 : vector<8x1xf32>
    %104 = math.rsqrt %103 : vector<8x1xf32>
    %105 = arith.mulf %87, %104 : vector<8x1xf32>
    %106 = arith.mulf %92, %105 : vector<8x1xf32>
    %107 = arith.subf %88, %106 : vector<8x1xf32>
    %108 = vector.broadcast %105 : vector<8x1xf32> to vector<8x128xf32>
    %109 = arith.mulf %86, %108 : vector<8x128xf32>
    %110 = vector.broadcast %107 : vector<8x1xf32> to vector<8x128xf32>
    %111 = arith.addf %109, %110 : vector<8x128xf32>
    %cst_45 = arith.constant 0.000000e+00 : f32
    %112 = vector.broadcast %cst_45 : f32 to vector<8x128xf32>
    %113 = arith.maximumf %111, %112 : vector<8x128xf32>
    %c3_i32_46 = arith.constant 3 : i32
    %114 = tpu.dynamic_rotate %113 by %c3_i32_46 dim 1 : vector<8x128xf32>, i32 -> vector<8x128xf32>
    %cst_47 = arith.constant 0.000000e+00 : f32
    %115 = vector.shape_cast %18 : vector<1x128xi1> to vector<1x128xi1>
    %116 = vector.broadcast %115 : vector<1x128xi1> to vector<8x128xi1>
    %117 = vector.broadcast %cst_47 : f32 to vector<8x128xf32>
    %118 = arith.select %116, %114, %117 : vector<8x128xi1>, vector<8x128xf32>
    %c0_48 = arith.constant 0 : index
    %c0_49 = arith.constant 0 : index
    %c0_50 = arith.constant 0 : index
    %119 = vector.load %arg4[%c0_48, %c0_49, %c0_50] : memref<7x8x8xf32, #tpu.memory_space<vmem>>, vector<1x8x8xf32>
    %120 = vector.shape_cast %119 : vector<1x8x8xf32> to vector<8x8xf32>
    %cst_51 = arith.constant dense<0.000000e+00> : vector<8x128xf32>
    %121 = tpu.matmul %120, %118, %cst_51 {dimension_numbers = #tpu.dot_dimension_numbers<[1], [0], [0], [1], [0, 0, 1, 1], [], []>} : vector<8x8xf32>, vector<8x128xf32>, vector<8x128xf32> -> vector<8x128xf32>
    %c2_i32_52 = arith.constant 2 : i32
    %122 = tpu.dynamic_rotate %113 by %c2_i32_52 dim 1 : vector<8x128xf32>, i32 -> vector<8x128xf32>
    %cst_53 = arith.constant 0.000000e+00 : f32
    %123 = vector.shape_cast %20 : vector<1x128xi1> to vector<1x128xi1>
    %124 = vector.broadcast %123 : vector<1x128xi1> to vector<8x128xi1>
    %125 = vector.broadcast %cst_53 : f32 to vector<8x128xf32>
    %126 = arith.select %124, %122, %125 : vector<8x128xi1>, vector<8x128xf32>
    %c1_54 = arith.constant 1 : index
    %c0_55 = arith.constant 0 : index
    %c0_56 = arith.constant 0 : index
    %127 = vector.load %arg4[%c1_54, %c0_55, %c0_56] : memref<7x8x8xf32, #tpu.memory_space<vmem>>, vector<1x8x8xf32>
    %128 = vector.shape_cast %127 : vector<1x8x8xf32> to vector<8x8xf32>
    %cst_57 = arith.constant dense<0.000000e+00> : vector<8x128xf32>
    %129 = tpu.matmul %128, %126, %cst_57 {dimension_numbers = #tpu.dot_dimension_numbers<[1], [0], [0], [1], [0, 0, 1, 1], [], []>} : vector<8x8xf32>, vector<8x128xf32>, vector<8x128xf32> -> vector<8x128xf32>
    %130 = arith.addf %121, %129 : vector<8x128xf32>
    %c1_i32_58 = arith.constant 1 : i32
    %131 = tpu.dynamic_rotate %113 by %c1_i32_58 dim 1 : vector<8x128xf32>, i32 -> vector<8x128xf32>
    %cst_59 = arith.constant 0.000000e+00 : f32
    %132 = vector.shape_cast %22 : vector<1x128xi1> to vector<1x128xi1>
    %133 = vector.broadcast %132 : vector<1x128xi1> to vector<8x128xi1>
    %134 = vector.broadcast %cst_59 : f32 to vector<8x128xf32>
    %135 = arith.select %133, %131, %134 : vector<8x128xi1>, vector<8x128xf32>
    %c2_60 = arith.constant 2 : index
    %c0_61 = arith.constant 0 : index
    %c0_62 = arith.constant 0 : index
    %136 = vector.load %arg4[%c2_60, %c0_61, %c0_62] : memref<7x8x8xf32, #tpu.memory_space<vmem>>, vector<1x8x8xf32>
    %137 = vector.shape_cast %136 : vector<1x8x8xf32> to vector<8x8xf32>
    %cst_63 = arith.constant dense<0.000000e+00> : vector<8x128xf32>
    %138 = tpu.matmul %137, %135, %cst_63 {dimension_numbers = #tpu.dot_dimension_numbers<[1], [0], [0], [1], [0, 0, 1, 1], [], []>} : vector<8x8xf32>, vector<8x128xf32>, vector<8x128xf32> -> vector<8x128xf32>
    %139 = arith.addf %130, %138 : vector<8x128xf32>
    %c3_64 = arith.constant 3 : index
    %c0_65 = arith.constant 0 : index
    %c0_66 = arith.constant 0 : index
    %140 = vector.load %arg4[%c3_64, %c0_65, %c0_66] : memref<7x8x8xf32, #tpu.memory_space<vmem>>, vector<1x8x8xf32>
    %141 = vector.shape_cast %140 : vector<1x8x8xf32> to vector<8x8xf32>
    %cst_67 = arith.constant dense<0.000000e+00> : vector<8x128xf32>
    %142 = tpu.matmul %141, %113, %cst_67 {dimension_numbers = #tpu.dot_dimension_numbers<[1], [0], [0], [1], [0, 0, 1, 1], [], []>} : vector<8x8xf32>, vector<8x128xf32>, vector<8x128xf32> -> vector<8x128xf32>
    %143 = arith.addf %139, %142 : vector<8x128xf32>
    %c127_i32_68 = arith.constant 127 : i32
    %144 = tpu.dynamic_rotate %113 by %c127_i32_68 dim 1 : vector<8x128xf32>, i32 -> vector<8x128xf32>
    %cst_69 = arith.constant 0.000000e+00 : f32
    %145 = vector.shape_cast %24 : vector<1x128xi1> to vector<1x128xi1>
    %146 = vector.broadcast %145 : vector<1x128xi1> to vector<8x128xi1>
    %147 = vector.broadcast %cst_69 : f32 to vector<8x128xf32>
    %148 = arith.select %146, %144, %147 : vector<8x128xi1>, vector<8x128xf32>
    %c4_70 = arith.constant 4 : index
    %c0_71 = arith.constant 0 : index
    %c0_72 = arith.constant 0 : index
    %149 = vector.load %arg4[%c4_70, %c0_71, %c0_72] : memref<7x8x8xf32, #tpu.memory_space<vmem>>, vector<1x8x8xf32>
    %150 = vector.shape_cast %149 : vector<1x8x8xf32> to vector<8x8xf32>
    %cst_73 = arith.constant dense<0.000000e+00> : vector<8x128xf32>
    %151 = tpu.matmul %150, %148, %cst_73 {dimension_numbers = #tpu.dot_dimension_numbers<[1], [0], [0], [1], [0, 0, 1, 1], [], []>} : vector<8x8xf32>, vector<8x128xf32>, vector<8x128xf32> -> vector<8x128xf32>
    %152 = arith.addf %143, %151 : vector<8x128xf32>
    %c126_i32_74 = arith.constant 126 : i32
    %153 = tpu.dynamic_rotate %113 by %c126_i32_74 dim 1 : vector<8x128xf32>, i32 -> vector<8x128xf32>
    %cst_75 = arith.constant 0.000000e+00 : f32
    %154 = vector.shape_cast %26 : vector<1x128xi1> to vector<1x128xi1>
    %155 = vector.broadcast %154 : vector<1x128xi1> to vector<8x128xi1>
    %156 = vector.broadcast %cst_75 : f32 to vector<8x128xf32>
    %157 = arith.select %155, %153, %156 : vector<8x128xi1>, vector<8x128xf32>
    %c5_76 = arith.constant 5 : index
    %c0_77 = arith.constant 0 : index
    %c0_78 = arith.constant 0 : index
    %158 = vector.load %arg4[%c5_76, %c0_77, %c0_78] : memref<7x8x8xf32, #tpu.memory_space<vmem>>, vector<1x8x8xf32>
    %159 = vector.shape_cast %158 : vector<1x8x8xf32> to vector<8x8xf32>
    %cst_79 = arith.constant dense<0.000000e+00> : vector<8x128xf32>
    %160 = tpu.matmul %159, %157, %cst_79 {dimension_numbers = #tpu.dot_dimension_numbers<[1], [0], [0], [1], [0, 0, 1, 1], [], []>} : vector<8x8xf32>, vector<8x128xf32>, vector<8x128xf32> -> vector<8x128xf32>
    %161 = arith.addf %152, %160 : vector<8x128xf32>
    %c125_i32_80 = arith.constant 125 : i32
    %162 = tpu.dynamic_rotate %113 by %c125_i32_80 dim 1 : vector<8x128xf32>, i32 -> vector<8x128xf32>
    %cst_81 = arith.constant 0.000000e+00 : f32
    %163 = vector.shape_cast %28 : vector<1x128xi1> to vector<1x128xi1>
    %164 = vector.broadcast %163 : vector<1x128xi1> to vector<8x128xi1>
    %165 = vector.broadcast %cst_81 : f32 to vector<8x128xf32>
    %166 = arith.select %164, %162, %165 : vector<8x128xi1>, vector<8x128xf32>
    %c6_82 = arith.constant 6 : index
    %c0_83 = arith.constant 0 : index
    %c0_84 = arith.constant 0 : index
    %167 = vector.load %arg4[%c6_82, %c0_83, %c0_84] : memref<7x8x8xf32, #tpu.memory_space<vmem>>, vector<1x8x8xf32>
    %168 = vector.shape_cast %167 : vector<1x8x8xf32> to vector<8x8xf32>
    %cst_85 = arith.constant dense<0.000000e+00> : vector<8x128xf32>
    %169 = tpu.matmul %168, %166, %cst_85 {dimension_numbers = #tpu.dot_dimension_numbers<[1], [0], [0], [1], [0, 0, 1, 1], [], []>} : vector<8x8xf32>, vector<8x128xf32>, vector<8x128xf32> -> vector<8x128xf32>
    %170 = arith.addf %161, %169 : vector<8x128xf32>
    %c0_86 = arith.constant 0 : index
    %c0_87 = arith.constant 0 : index
    %171 = vector.load %arg5[%c0_86, %c0_87] : memref<8x1xf32, #tpu.memory_space<vmem>>, vector<8x1xf32>
    %c0_88 = arith.constant 0 : index
    %c0_89 = arith.constant 0 : index
    %172 = vector.load %arg6[%c0_88, %c0_89] : memref<8x1xf32, #tpu.memory_space<vmem>>, vector<8x1xf32>
    %cst_90 = arith.constant dense<0.000000e+00> : vector<8xf32>
    %173 = vector.multi_reduction <add>, %170, %cst_90 [1] : vector<8x128xf32> to vector<8xf32>
    %174 = vector.shape_cast %173 : vector<8xf32> to vector<8x1xf32>
    %cst_91 = arith.constant 7.812500e-03 : f32
    %175 = vector.broadcast %cst_91 : f32 to vector<8x1xf32>
    %176 = arith.mulf %174, %175 : vector<8x1xf32>
    %177 = arith.mulf %170, %170 : vector<8x128xf32>
    %cst_92 = arith.constant dense<0.000000e+00> : vector<8xf32>
    %178 = vector.multi_reduction <add>, %177, %cst_92 [1] : vector<8x128xf32> to vector<8xf32>
    %179 = vector.shape_cast %178 : vector<8xf32> to vector<8x1xf32>
    %cst_93 = arith.constant 7.812500e-03 : f32
    %180 = vector.broadcast %cst_93 : f32 to vector<8x1xf32>
    %181 = arith.mulf %179, %180 : vector<8x1xf32>
    %182 = arith.mulf %176, %176 : vector<8x1xf32>
    %183 = arith.subf %181, %182 : vector<8x1xf32>
    %cst_94 = arith.constant 0.000000e+00 : f32
    %184 = vector.broadcast %cst_94 : f32 to vector<8x1xf32>
    %185 = arith.maximumf %183, %184 : vector<8x1xf32>
    %cst_95 = arith.constant 9.99999974E-6 : f32
    %186 = vector.broadcast %cst_95 : f32 to vector<8x1xf32>
    %187 = arith.addf %185, %186 : vector<8x1xf32>
    %188 = math.rsqrt %187 : vector<8x1xf32>
    %189 = arith.mulf %171, %188 : vector<8x1xf32>
    %190 = arith.mulf %176, %189 : vector<8x1xf32>
    %191 = arith.subf %172, %190 : vector<8x1xf32>
    %192 = vector.broadcast %189 : vector<8x1xf32> to vector<8x128xf32>
    %193 = arith.mulf %170, %192 : vector<8x128xf32>
    %194 = vector.broadcast %191 : vector<8x1xf32> to vector<8x128xf32>
    %195 = arith.addf %193, %194 : vector<8x128xf32>
    %c0_96 = arith.constant 0 : index
    %c0_97 = arith.constant 0 : index
    %196 = vector.load %arg7[%c0_96, %c0_97] : memref<8x8xf32, #tpu.memory_space<vmem>>, vector<8x8xf32>
    %cst_98 = arith.constant dense<0.000000e+00> : vector<8x128xf32>
    %197 = tpu.matmul %196, %29, %cst_98 {dimension_numbers = #tpu.dot_dimension_numbers<[1], [0], [0], [1], [0, 0, 1, 1], [], []>} : vector<8x8xf32>, vector<8x128xf32>, vector<8x128xf32> -> vector<8x128xf32>
    %c0_99 = arith.constant 0 : index
    %c0_100 = arith.constant 0 : index
    %198 = vector.load %arg8[%c0_99, %c0_100] : memref<8x1xf32, #tpu.memory_space<vmem>>, vector<8x1xf32>
    %199 = vector.broadcast %198 : vector<8x1xf32> to vector<8x128xf32>
    %200 = arith.addf %197, %199 : vector<8x128xf32>
    %201 = arith.addf %195, %200 : vector<8x128xf32>
    %cst_101 = arith.constant 0.000000e+00 : f32
    %202 = vector.broadcast %cst_101 : f32 to vector<8x128xf32>
    %203 = arith.maximumf %201, %202 : vector<8x128xf32>
    %c0_102 = arith.constant 0 : index
    %c0_103 = arith.constant 0 : index
    %204 = vector.load %arg9[%c0_102, %c0_103] : memref<8x128xf32, #tpu.memory_space<vmem>>, vector<8x128xf32>
    tpu.vector_store %arg9[%c0_102, %c0_103], %203 {strides = array<i32>} : memref<8x128xf32, #tpu.memory_space<vmem>>, vector<8x128xf32>,
    return
  }
}

</mosaic_0001>

<bundles_post_ra>
// kernel: tpu_custom_call.1
= control target key start
LH: loop header
LB: loop body
LE: loop exit
PB: predicated region body
PF: predicated region fallthrough
CT: control target
= control target key end

     0   :  { %14 = vsyncpa [#allocation3], 0  ;;  %s1859_s0 = inlined_call_operand.hbm [shape: f32[8,128], index: 0, kind: input, shape index: {}]   ;;  %s1860_s1 = inlined_call_operand.hbm [shape: f32[7,8,8], index: 1, kind: input, shape index: {}]   ;;  %s1861_s2 = inlined_call_operand.vmem [shape: f32[8,1], index: 2, kind: input, shape index: {}]   ;;  %s1862_s3 = inlined_call_operand.vmem [shape: f32[8,1], index: 3, kind: input, shape index: {}]   ;;  %s1863_s4 = inlined_call_operand.vmem [shape: f32[7,8,8], index: 4, kind: input, shape index: {}]   ;;  %s1864_s5 = inlined_call_operand.vmem [shape: f32[8,1], index: 5, kind: input, shape index: {}]   ;;  %s1865_s6 = inlined_call_operand.vmem [shape: f32[8,1], index: 6, kind: input, shape index: {}]   ;;  %s1866_s7 = inlined_call_operand.vmem [shape: f32[8,8], index: 7, kind: input, shape index: {}]   ;;  %s1867_s8 = inlined_call_operand.vmem [shape: f32[8,1], index: 8, kind: input, shape index: {}]   ;;  %s1868_s9 = inlined_call_operand.hbm [shape: f32[8,128], index: 9, kind: output, shape index: {}]  }
   0x1   :  { %15 = vsyncpa [#allocation6], 0 }
   0x2   :  { %16 = vsyncpa [#allocation4], 0  ;;  %s1599_s30 = smov [#allocation2]   ;;  %s1600_s11 = smov [#allocation5]  }
   0x3   :  { %s23_s10 = sshll.u32 %s1599_s30, 4  ;;  %s32_s12 = sshll.u32 %s1600_s11, 4  ;;  %s24_s10 = int_to_ptr.vmem [resolvable:$true] %s23_s10  ;;  %s1663_s12 = int_to_ptr.vmem [resolvable:$true] %s32_s12 }
   0x4   :  { %s1527_s15 = scalar_lea.hbm %s1859_s0, 128 }
   0x5   :  { %p1528_p0 = scmp.ne.s32.totalorder %s1859_s0, %s1527_s15  ;;  %p1531_p1 = scmp.lt.u32.totalorder %s1527_s15, %s1859_s0 }
   0x7   :  { %p1533_p2 = pnand %p1531_p1, %p1528_p0 }
   0x9   :  { %1536 = shalt.err (!%p1533_p2)
}
   0xa   :  { %s1537_s20 = scalar_lea.vmem %s24_s10, 128  ;;  %p1542_p4 = scmp.lt.s32.totalorder %s24_s10, %s24_s10 }
   0xb   :  { %p1538_p3 = scmp.ne.s32.totalorder %s24_s10, %s1537_s20  ;;  %p1543_p5 = scmp.lt.s32.totalorder %s1537_s20, %s1537_s20 }
   0xd   :  { %p1544_p6 = por %p1543_p5, %p1542_p4 }
   0xf   :  { %p1545_p7 = pnand %p1544_p6, %p1538_p3 }
  0x11   :  { %1548 = shalt.err (!%p1545_p7)
}
  0x12   :  { %26 = dma.hbm_to_vmem [thread:$0]  %s1859_s0, 128, %s24_s10, [#allocation3]  }
  0x13   :  { %s1549_s25 = scalar_lea.hbm %s1860_s1, 896 }
  0x14   :  { %p1550_p8 = scmp.ne.s32.totalorder %s1860_s1, %s1549_s25  ;;  %p1553_p9 = scmp.lt.u32.totalorder %s1549_s25, %s1860_s1 }
  0x16   :  { %p1555_p10 = pnand %p1553_p9, %p1550_p8 }
  0x18   :  { %1558 = shalt.err (!%p1555_p10)
}
  0x19   :  { %s1559_s30 = scalar_lea.vmem %s1663_s12, 896  ;;  %p1564_p12 = scmp.lt.s32.totalorder %s1663_s12, %s1663_s12 }
  0x1a   :  { %p1560_p11 = scmp.ne.s32.totalorder %s1663_s12, %s1559_s30  ;;  %p1565_p13 = scmp.lt.s32.totalorder %s1559_s30, %s1559_s30 }
  0x1c   :  { %p1566_p0 = por %p1565_p13, %p1564_p12 }
  0x1e   :  { %p1567_p1 = pnand %p1566_p0, %p1560_p11 }
  0x20   :  { %1570 = shalt.err (!%p1567_p1)
}
  0x21   :  { %s1601_s0 = smov 128   ;;  %s1602_s10 = smov 8  }
  0x22   :  { %38 = dma.hbm_to_vmem [thread:$0]  %s1860_s1, 896, %s1663_s12, [#allocation6], %s1601_s0, %s1601_s0, %s1602_s10  }
  0x23   :  { %1593 = dma.done.wait [#allocation3], 128  }
  0x24   :  { %1594 = vsyncadd [#allocation3], 4294967168 }
  0x25   :  { %1595 = dma.done.wait [#allocation6], 896  }
  0x26   :  { %1596 = vsyncadd [#allocation6], 4294966400  ;;  %v1603_v0 = vmov 0.0   ;;  %vm1604_vm0 = vmmov 0   ;;  %v1700_v1 = vld [vmem:[#allocation2] sm:$0xff]  ;;  %s1605_s14 = smov 2   ;;  %v59_v2 = vlaneseq }
  0x27   :  { %1408 = vmatprep.subr.mxu0 %v1603_v0  ;;  %1410 = vmatprep.mubr.msk.f32.mxu0 %vm1604_vm0, %v1603_v0  ;;  %s1606_s1 = smov 1   ;;  %s1607_s12 = smov 3   ;;  %v92_v5 = vld [vmem:[#allocation5 + $0x8] sm:$0xff]  ;;  %vm93_vm2 = vcmask 64512   ;;  %v85_v8 = vld [vmem:[#allocation5] sm:$0xff]  ;;  %v246_v10 = vld [vmem:[#allocation5 + $0x10] sm:$0xff] }
  0x28   :  { %1443 = vmatprep.subr.mxu1 %v1603_v0  ;;  %1445 = vmatprep.mubr.msk.f32.mxu1 %vm1604_vm0, %v1603_v0  ;;  %s1608_s15 = smov 127   ;;  %s1609_s16 = smov 126   ;;  %v60_v3 = vand.u32 127, %v59_v2  ;;  %v322_v11 = vld [vmem:[#allocation5 + $0x18] sm:$0xff]  ;;  %v403_v13 = vld [vmem:[#allocation5 + $0x20] sm:$0xff]  ;;  %v484_v15 = vld [vmem:[#allocation5 + $0x28] sm:$0xff] }
  0x29   :  { %86 = vrot.lane.b32.xlu0 %v1700_v1, %s1605_s14  ;;  %240 = vrot.lane.b32.xlu1 %v1700_v1, %s1606_s1  ;;  %s1610_s17 = smov 125   ;;  %v565_v17 = vld [vmem:[#allocation5 + $0x30] sm:$0xff]  ;;  %v1611_v21 = vmov 0   ;;  %v640_v30 = vld [vmem:[%s1861_s2] sm:$0xff]  ;;  %v1358_v41 = vld [vmem:[%s1863_s4 + $0x8] sm:$0xff] }
  0x2a   :  { %v1714_v4 = vand.u32 63, %v60_v3  ;;  %1521 = vset.pattern.permute.xlu0 %v1611_v21  ;;  %1522 = vset.pattern.permute.xlu1 %v1611_v21  ;;  %v641_v33 = vld [vmem:[%s1862_s3] sm:$0xff]  ;;  %v1363_v46 = vld [vmem:[%s1863_s4 + $0x10] sm:$0xff]  ;;  %v1366_v47 = vld [vmem:[%s1863_s4 + $0x18] sm:$0xff] }
  0x2b   :  { %v673_v44 = vld [vmem:[%s1863_s4] sm:$0xff]  ;;  %v1371_v51 = vld [vmem:[%s1863_s4 + $0x28] sm:$0xff]  ;;  %v1374_v53 = vld [vmem:[%s1863_s4 + $0x30] sm:$0xff] }
  0x2c   :  { %vm74_vm1 = vcmp.ge.s32.totalorder %v1714_v4, 2  ;;  %vm73_vm3 = vcmp.ge.s32.totalorder %v1714_v4, 3  ;;  %vm75_vm4 = vcmp.ge.s32.totalorder %v1714_v4, 1  ;;  %vm76_vm5 = vcmp.lt.s32.totalorder %v1714_v4, 63  ;;  %v1368_v49 = vld [vmem:[%s1863_s4 + $0x20] sm:$0xff] }
  0x2d   :  { %80 = vrot.lane.b32.xlu0 %v1700_v1, %s1607_s12  ;;  %397 = vrot.lane.b32.xlu1 %v1700_v1, %s1608_s15  ;;  %vm77_vm6 = vcmp.lt.s32.totalorder %v1714_v4, 62  ;;  %vm78_vm7 = vcmp.lt.s32.totalorder %v1714_v4, 61  ;;  %v1246_v54 = vld [vmem:[%s1866_s7] sm:$0xff] }
  0x2e   :  { %v1217_v2 = vld [vmem:[%s1864_s5] sm:$0xff]  ;;  %s1612_s5 = smov [#allocation7]  }
  0x31   :  { %478 = vrot.lane.b32.xlu0 %v1700_v1, %s1609_s16  ;;  %559 = vrot.lane.b32.xlu1 %v1700_v1, %s1610_s17 }
  0x9b   :  { %v87_v6 = vpop.permute.xlu0 %86  ;;  %v241_v9 = vpop.permute.xlu1 %240 }
  0x9c   :  { %1409 = vmatpush3.msk.msra.mxu0 %vm74_vm1, %v87_v6 }
  0x9d   :  { %1411 = vmatmul.mubr.msk.f32.vlgmr.msra.gmra.mrb[0].mxu0 %vm93_vm2, %v92_v5  ;;  %1413 = vmatprep.subr.mxu0 %v1603_v0  ;;  %v1218_v5 = vld [vmem:[%s1865_s6] sm:$0xff] }
  0x9e   :  { %1415 = vmatprep.mubr.msk.f32.mxu0 %vm1604_vm0, %v1603_v0 }
  0x9f   :  { %v81_v7 = vpop.permute.xlu0 %80  ;;  %v398_v12 = vpop.permute.xlu1 %397 }
  0xa0   :  { %1414 = vmatpush3.msk.msra.mxu0 %vm73_vm3, %v81_v7  ;;  %v1247_v7 = vld [vmem:[%s1867_s8] sm:$0xff] }
  0xa1   :  { %1418 = vmatprep.subr.mxu0 %v1603_v0 }
  0xa3   :  { %v479_v14 = vpop.permute.xlu0 %478  ;;  %v560_v16 = vpop.permute.xlu1 %559 }
  0xa5   :  { %1416 = vmatmul.mubr.msk.f32.vlgmr.msra.gmra.mrb[0].mxu0 %vm93_vm2, %v85_v8 }
  0xa6   :  { %1419 = vmatpush3.msk.msra.mxu0 %vm75_vm4, %v241_v9  ;;  %1420 = vmatprep.mubr.msk.f32.mxu0 %vm1604_vm0, %v1603_v0 }
  0xa7   :  { %1423 = vmatprep.subr.mxu0 %v1603_v0 }
  0xad   :  { %1421 = vmatmul.mubr.msk.f32.vlgmr.msra.gmra.mrb[0].mxu0 %vm93_vm2, %v246_v10 }
  0xae   :  { %1424 = vmatpush3.msra.mxu0 %v1700_v1  ;;  %1425 = vmatprep.mubr.msk.f32.mxu0 %vm1604_vm0, %v1603_v0 }
  0xaf   :  { %1428 = vmatprep.subr.mxu0 %v1603_v0 }
  0xb5   :  { %1426 = vmatmul.mubr.msk.f32.vlgmr.msra.gmra.mrb[0].mxu0 %vm93_vm2, %v322_v11 }
  0xb6   :  { %1429 = vmatpush3.msk.msra.mxu0 %vm76_vm5, %v398_v12  ;;  %1430 = vmatprep.mubr.msk.f32.mxu0 %vm1604_vm0, %v1603_v0 }
  0xb7   :  { %1433 = vmatprep.subr.mxu0 %v1603_v0 }
  0xbd   :  { %1431 = vmatmul.mubr.msk.f32.vlgmr.msra.gmra.mrb[0].mxu0 %vm93_vm2, %v403_v13 }
  0xbe   :  { %1434 = vmatpush3.msk.msra.mxu0 %vm77_vm6, %v479_v14  ;;  %1435 = vmatprep.mubr.msk.f32.mxu0 %vm1604_vm0, %v1603_v0 }
  0xbf   :  { %1438 = vmatprep.subr.mxu0 %v1603_v0 }
  0xc5   :  { %1436 = vmatmul.mubr.msk.f32.vlgmr.msra.gmra.mrb[0].mxu0 %vm93_vm2, %v484_v15 }
  0xc6   :  { %1439 = vmatpush3.msk.msra.mxu0 %vm78_vm7, %v560_v16  ;;  %1440 = vmatprep.mubr.msk.f32.mxu0 %vm1604_vm0, %v1603_v0 }
  0xc7   :  { %1478 = vmatprep.subr.mxu0 %v1603_v0 }
  0xcd   :  { %1441 = vmatmul.mubr.msk.f32.vlgmr.msra.gmra.mrb[0].mxu0 %vm93_vm2, %v565_v17 }
  0xce   :  { %1479 = vmatpush3.msra.mxu0 %v1700_v1  ;;  %1480 = vmatprep.mubr.msk.f32.mxu0 %vm1604_vm0, %v1603_v0 }
  0xd1   :  { %1481 = vmatmul.mubr.msk.f32.vlgmr.msra.gmra.mrb[2].mxu0 %vm93_vm2, %v1246_v54 }
 0x1a0   :  { %v635_v18 = vpop.f32.mrb[0].mxu0 }
 0x1a1   :  { %642 = vadd.xlane.f32.xlu0 %v635_v18  ;;  %v1442_v19 = vpop.f32.mrb[1].mxu0  ;;  %v645_v20 = vmul.f32 %v635_v18, %v635_v18 }
 0x1a3   :  { %646 = vadd.xlane.f32.xlu1 %v645_v20 }
 0x1a4   :  { %v1322_v9 = vpop.f32.mrb[2].mxu0 }
 0x1a5   :  { %v1482_v10 = vpop.f32.mrb[3].mxu0 }
 0x22e   :  { %v643_v22 = vpop.xlane.xlu0 %642 }
 0x22f   :  { %v644_v23 = vmul.f32 0.0078125, %v643_v22 }
 0x230   :  { %v647_v24 = vpop.xlane.xlu1 %646 }
 0x231   :  { %v649_v25 = vmul.f32 %v644_v23, %v644_v23  ;;  %v648_v26 = vmul.f32 0.0078125, %v647_v24 }
 0x233   :  { %v650_v27 = vsub.f32 %v648_v26, %v649_v25 }
 0x235   :  { %v651_v28 = vmax.f32 %v650_v27, 0.0 }
 0x237   :  { %v652_v29 = vadd.f32 1e-05, %v651_v28 }
 0x239   :  { %1523 = vrsqrt.f32 %v652_v29 }
 0x243   :  { %v1524_v31 = vpop.eup %1523 }
 0x244   :  { %v654_v32 = vmul.f32 %v1524_v31, %v640_v30 }
 0x246   :  { %659 = vperm.xlu0 %1521, %v654_v32   ;;  %v655_v34 = vmul.f32 %v654_v32, %v644_v23 }
 0x248   :  { %v656_v35 = vsub.f32 %v641_v33, %v655_v34 }
 0x24a   :  { %665 = vperm.xlu1 %1522, %v656_v35  }
 0x2c5   :  { %v660_v36 = vpop.permute.xlu0 %659 }
 0x2c6   :  { %v662_v37 = vmul.f32 %v660_v36, %v635_v18 }
 0x2c9   :  { %v666_v38 = vpop.permute.xlu1 %665 }
 0x2ca   :  { %v668_v39 = vadd.f32 %v666_v38, %v662_v37 }
 0x2cc   :  { %v669_v40 = vmax.f32 %v668_v39, 0.0 }
 0x2ce   :  { %674 = vrot.lane.b32.xlu1 %v669_v40, %s1605_s14 }
 0x2d2   :  { %670 = vrot.lane.b32.xlu1 %v669_v40, %s1607_s12 }
 0x2d6   :  { %825 = vrot.lane.b32.xlu1 %v669_v40, %s1606_s1 }
 0x2da   :  { %980 = vrot.lane.b32.xlu1 %v669_v40, %s1608_s15 }
 0x2de   :  { %1059 = vrot.lane.b32.xlu1 %v669_v40, %s1609_s16 }
 0x2e2   :  { %1138 = vrot.lane.b32.xlu1 %v669_v40, %s1610_s17  ;;  %s1335_s17 = sshll.u32 %s1612_s5, 4  ;;  %s1336_s17 = int_to_ptr.vmem [resolvable:$true] %s1335_s17 }
 0x2e3   :  { %s1571_s6 = scalar_lea.vmem %s1336_s17, 128  ;;  %p1576_p3 = scmp.lt.s32.totalorder %s1336_s17, %s1336_s17 }
 0x2e4   :  { %p1572_p2 = scmp.ne.s32.totalorder %s1336_s17, %s1571_s6  ;;  %p1577_p4 = scmp.lt.s32.totalorder %s1571_s6, %s1571_s6 }
 0x2e6   :  { %p1578_p5 = por %p1577_p4, %p1576_p3 }
 0x2e8   :  { %p1579_p6 = pnand %p1578_p5, %p1572_p2 }
 0x340   :  { %v675_v42 = vpop.permute.xlu1 %674 }
 0x341   :  { %1444 = vmatpush3.msk.msra.mxu1 %vm74_vm1, %v675_v42 }
 0x342   :  { %1446 = vmatmul.mubr.msk.f32.vlgmr.msra.gmra.mrb[0].mxu1 %vm93_vm2, %v1358_v41  ;;  %1448 = vmatprep.subr.mxu1 %v1603_v0 }
 0x343   :  { %1450 = vmatprep.mubr.msk.f32.mxu1 %vm1604_vm0, %v1603_v0 }
 0x344   :  { %v671_v43 = vpop.permute.xlu1 %670 }
 0x345   :  { %1449 = vmatpush3.msk.msra.mxu1 %vm73_vm3, %v671_v43 }
 0x346   :  { %1453 = vmatprep.subr.mxu1 %v1603_v0 }
 0x348   :  { %v826_v45 = vpop.permute.xlu1 %825 }
 0x34a   :  { %1451 = vmatmul.mubr.msk.f32.vlgmr.msra.gmra.mrb[0].mxu1 %vm93_vm2, %v673_v44 }
 0x34b   :  { %1454 = vmatpush3.msk.msra.mxu1 %vm75_vm4, %v826_v45  ;;  %1455 = vmatprep.mubr.msk.f32.mxu1 %vm1604_vm0, %v1603_v0 }
 0x34c   :  { %1458 = vmatprep.subr.mxu1 %v1603_v0  ;;  %v981_v48 = vpop.permute.xlu1 %980 }
 0x350   :  { %v1060_v50 = vpop.permute.xlu1 %1059 }
 0x352   :  { %1456 = vmatmul.mubr.msk.f32.vlgmr.msra.gmra.mrb[0].mxu1 %vm93_vm2, %v1363_v46 }
 0x353   :  { %1459 = vmatpush3.msra.mxu1 %v669_v40  ;;  %1460 = vmatprep.mubr.msk.f32.mxu1 %vm1604_vm0, %v1603_v0 }
 0x354   :  { %1463 = vmatprep.subr.mxu1 %v1603_v0  ;;  %v1139_v52 = vpop.permute.xlu1 %1138 }
 0x35a   :  { %1461 = vmatmul.mubr.msk.f32.vlgmr.msra.gmra.mrb[0].mxu1 %vm93_vm2, %v1366_v47 }
 0x35b   :  { %1464 = vmatpush3.msk.msra.mxu1 %vm76_vm5, %v981_v48  ;;  %1465 = vmatprep.mubr.msk.f32.mxu1 %vm1604_vm0, %v1603_v0 }
 0x35c   :  { %1468 = vmatprep.subr.mxu1 %v1603_v0 }
 0x362   :  { %1466 = vmatmul.mubr.msk.f32.vlgmr.msra.gmra.mrb[0].mxu1 %vm93_vm2, %v1368_v49 }
 0x363   :  { %1469 = vmatpush3.msk.msra.mxu1 %vm77_vm6, %v1060_v50  ;;  %1470 = vmatprep.mubr.msk.f32.mxu1 %vm1604_vm0, %v1603_v0 }
 0x364   :  { %1473 = vmatprep.subr.mxu1 %v1603_v0 }
 0x36a   :  { %1471 = vmatmul.mubr.msk.f32.vlgmr.msra.gmra.mrb[0].mxu1 %vm93_vm2, %v1371_v51 }
 0x36b   :  { %1474 = vmatpush3.msk.msra.mxu1 %vm78_vm7, %v1139_v52  ;;  %1475 = vmatprep.mubr.msk.f32.mxu1 %vm1604_vm0, %v1603_v0 }
 0x372   :  { %1476 = vmatmul.mubr.msk.f32.vlgmr.msra.gmra.mrb[0].mxu1 %vm93_vm2, %v1374_v53 }
 0x445   :  { %v1212_v55 = vpop.f32.mrb[0].mxu1 }
 0x446   :  { %1219 = vadd.xlane.f32.xlu0 %v1212_v55  ;;  %v1477_v56 = vpop.f32.mrb[1].mxu1  ;;  %v1222_v57 = vmul.f32 %v1212_v55, %v1212_v55 }
 0x448   :  { %1223 = vadd.xlane.f32.xlu1 %v1222_v57 }
 0x4d3   :  { %v1220_v58 = vpop.xlane.xlu0 %1219 }
 0x4d4   :  { %v1221_v59 = vmul.f32 0.0078125, %v1220_v58 }
 0x4d5   :  { %v1224_v60 = vpop.xlane.xlu1 %1223 }
 0x4d6   :  { %v1226_v61 = vmul.f32 %v1221_v59, %v1221_v59  ;;  %v1225_v62 = vmul.f32 0.0078125, %v1224_v60 }
 0x4d8   :  { %v1227_v63 = vsub.f32 %v1225_v62, %v1226_v61 }
 0x4da   :  { %v1228_v0 = vmax.f32 %v1227_v63, 0.0 }
 0x4dc   :  { %v1229_v1 = vadd.f32 1e-05, %v1228_v0 }
 0x4de   :  { %1525 = vrsqrt.f32 %v1229_v1 }
 0x4e8   :  { %v1526_v3 = vpop.eup %1525 }
 0x4e9   :  { %v1231_v4 = vmul.f32 %v1526_v3, %v1217_v2 }
 0x4eb   :  { %1236 = vperm.xlu0 %1521, %v1231_v4   ;;  %v1232_v6 = vmul.f32 %v1231_v4, %v1221_v59 }
 0x4ed   :  { %v1233_v8 = vsub.f32 %v1218_v5, %v1232_v6 }
 0x4ef   :  { %1250 = vperm.xlu0 %1521, %v1247_v7   ;;  %1242 = vperm.xlu1 %1522, %v1233_v8  }
 0x56a   :  { %v1237_v11 = vpop.permute.xlu0 %1236 }
 0x56b   :  { %v1239_v12 = vmul.f32 %v1237_v11, %v1212_v55 }
 0x56e   :  { %v1251_v13 = vpop.permute.xlu0 %1250  ;;  %v1243_v14 = vpop.permute.xlu1 %1242 }
 0x56f   :  { %v1245_v15 = vadd.f32 %v1243_v14, %v1239_v12  ;;  %v1323_v16 = vadd.f32 %v1322_v9, %v1251_v13 }
 0x571   :  { %v1326_v17 = vadd.f32 %v1323_v16, %v1245_v15 }
 0x573   :  { %v1327_v18 = vmax.f32 %v1326_v17, 0.0 }
 0x575   :  { %1328 = vst [vmem:[#allocation7] sm:$0xff] %v1327_v18 }
 0x576   :  { %1582 = shalt.err (!%p1579_p6)
}
 0x577   :  { %s1583_s19 = scalar_lea.hbm %s1868_s9, 128 }
 0x578   :  { %p1584_p7 = scmp.ne.s32.totalorder %s1868_s9, %s1583_s19  ;;  %p1587_p8 = scmp.lt.u32.totalorder %s1583_s19, %s1868_s9 }
 0x57a   :  { %p1589_p9 = pnand %p1587_p8, %p1584_p7 }
 0x57c   :  { %1592 = shalt.err (!%p1589_p9)
}
 0x57d   :  { %1338 = dma.vmem_to_hbm [thread:$0]  %s1336_s17, 128, %s1868_s9, [#allocation4]  }
 0x57e   :  { %1597 = dma.done.wait [#allocation4], 128  }
 0x57f   :  { %1598 = vsyncadd [#allocation4], 4294967168 }
 0x580   :  { %1342 = vsyncpa [#allocation3], 1 }
 0x581   :  { %1343 = vsyncpa [#allocation6], 1 }
 0x582   :  { %1344 = vsyncpa [#allocation4], 1 }

</bundles_post_ra>
